<compile_context>
chip_gen: v5e
topology: v5e:2x2
jax: 0.10.0
libtpu: 0.0.40
codegen_flags: <defaults>
</compile_context>

<pallas_src>
import jax
import jax.numpy as jnp
from jax.experimental import pallas as pl
from jax.experimental.pallas import tpu as pltpu


def _zero_channel_kernel(ch_ref, x_ref, o_ref):
    # ch_ref: (1,) int32 in SMEM (scalar prefetch): channel to blacken, -1 = no-op.
    # x_ref / o_ref: (C, tile) lane-dense VMEM slabs of the flattened (C, H*W) image.
    ch = ch_ref[0]
    x = x_ref[...]
    row = jax.lax.broadcasted_iota(jnp.int32, x.shape, 0)  # channel id per sublane row
    o_ref[...] = jnp.where(row == ch, jnp.zeros_like(x), x)


def _pick_tile(n_flat, c, itemsize, target_bytes=2 * 1024 * 1024):
    """Largest power-of-two multiple of 128 dividing n_flat such that a (C, tile)
    block is ~target_bytes; falls back to the full (lane-dense) flat dim."""
    if n_flat % 128 != 0:
        return n_flat
    target_elems = max(128, target_bytes // max(1, c * itemsize))
    tile = 128
    while (tile * 2) <= target_elems and n_flat % (tile * 2) == 0:
        tile *= 2
    return tile


def zero_channel_pallas(img, channel, *, tile=None):
    """img: (C, H, W); channel: int32 scalar (-1 => identity).
    Returns img with that channel zeroed, same shape/dtype."""
    C, H, W = img.shape
    n = H * W
    if tile is None:
        tile = _pick_tile(n, C, img.dtype.itemsize)
    assert n % tile == 0, (n, tile)
    grid = (n // tile,)

    x2d = img.reshape(C, n)                              # contiguous -> free reshape
    ch_arr = jnp.asarray(channel, dtype=jnp.int32).reshape(1)

    out2d = pl.pallas_call(
        _zero_channel_kernel,
        out_shape=jax.ShapeDtypeStruct((C, n), img.dtype),
        grid_spec=pltpu.PrefetchScalarGridSpec(
            num_scalar_prefetch=1,
            grid=grid,
            in_specs=[pl.BlockSpec((C, tile), lambda i, ch: (0, i))],
            out_specs=pl.BlockSpec((C, tile), lambda i, ch: (0, i)),
        ),
        compiler_params=pltpu.CompilerParams(
            dimension_semantics=("parallel",),           # disjoint output tiles
            vmem_limit_bytes=32 * 1024 * 1024,
        ),
    )(ch_arr, x2d)
    return out2d.reshape(C, H, W)


def remove_channel(img, key, p=0.2):
    """JAX/Pallas port of remove_channel.forward (functional, not in-place)."""
    if min(img.shape) < 4:                               # same early-out as torch module
        return img
    k1, k2 = jax.random.split(key)
    u = jax.random.uniform(k1)
    cand = jnp.array([0, 2, 3], dtype=jnp.int32)
    pick = cand[jax.random.randint(k2, (), 0, 3)]
    ch = jnp.where(u <= p, pick, jnp.int32(-1))          # -1 => leave image untouched
    # TODO(synk): as a standalone augmentation this is pure memory bandwidth; the
    # Pallas kernel pays off when the zeroing is fused into adjacent Pallas work.
    return zero_channel_pallas(img, ch)


def _ref_zero_channel(img, ch):
    C = img.shape[0]
    mask = (jnp.arange(C, dtype=jnp.int32) == jnp.asarray(ch, jnp.int32))[:, None, None]
    return jnp.where(mask, jnp.zeros_like(img), img)


if __name__ == "__main__":
    key = jax.random.PRNGKey(0)
    C, H, W = 4, 16, 16
    img = jax.random.normal(key, (C, H, W), dtype=jnp.float32)

    # 1) Forced zeroing path (channel 2), single-block grid.
    out = jax.block_until_ready(zero_channel_pallas(img, 2))
    assert out.shape == img.shape and out.dtype == img.dtype
    assert jnp.array_equal(out, _ref_zero_channel(img, 2)), "mismatch (zero channel 2)"

    # 2) No-op path (channel = -1) on a multi-step grid (tile=128 -> 2 grid steps).
    out_id = jax.block_until_ready(zero_channel_pallas(img, -1, tile=128))
    assert jnp.array_equal(out_id, img), "mismatch (identity path)"

    # 3) Full module semantics, same random decision replayed in the reference.
    aug_key = jax.random.PRNGKey(0)
    out_mod = jax.block_until_ready(remove_channel(img, aug_key, p=0.2))
    k1, k2 = jax.random.split(aug_key)
    u = jax.random.uniform(k1)
    pick = jnp.array([0, 2, 3], jnp.int32)[jax.random.randint(k2, (), 0, 3)]
    ch_ref = jnp.where(u <= 0.2, pick, jnp.int32(-1))
    assert jnp.array_equal(out_mod, _ref_zero_channel(img, ch_ref)), "mismatch (module path)"

    print("KERNEL_OK")
</pallas_src>

<mosaic_0001>
module attributes {stable_mosaic.version = 11 : i64} {
  func.func @_zero_channel_kernel(%arg0: i32, %arg1: memref<1xi32, #tpu.memory_space<smem>>, %arg2: memref<4x256xf32, #tpu.memory_space<vmem>>, %arg3: memref<4x256xf32, #tpu.memory_space<vmem>>) attributes {dimension_semantics = [#tpu.dimension_semantics<parallel>], iteration_bounds = array<i64: 1>, scalar_prefetch = 1 : i64, scratch_operands = 0 : i64, tpu.core_type = #tpu.core_type<tc>, window_params = [{transform_indices = @transform_0, window_bounds = array<i64: 4, 256>}, {transform_indices = @transform_1, window_bounds = array<i64: 4, 256>}]} {
    %c0 = arith.constant 0 : index
    %0 = memref.load %arg1[%c0] : memref<1xi32, #tpu.memory_space<smem>>
    %c0_0 = arith.constant 0 : index
    %c0_1 = arith.constant 0 : index
    %1 = vector.load %arg2[%c0_0, %c0_1] : memref<4x256xf32, #tpu.memory_space<vmem>>, vector<4x256xf32>
    %2 = tpu.iota {dimensions = array<i32: 0>} : vector<4x256xi32>
    %3 = vector.broadcast %0 : i32 to vector<4x256xi32>
    %4 = arith.cmpi eq, %2, %3 : vector<4x256xi32>
    %cst = arith.constant 0.000000e+00 : f32
    %5 = vector.broadcast %cst : f32 to vector<4x256xf32>
    %6 = arith.select %4, %5, %1 : vector<4x256xi1>, vector<4x256xf32>
    %c0_2 = arith.constant 0 : index
    %c0_3 = arith.constant 0 : index
    %7 = vector.load %arg3[%c0_2, %c0_3] : memref<4x256xf32, #tpu.memory_space<vmem>>, vector<4x256xf32>
    tpu.vector_store %arg3[%c0_2, %c0_3], %6 {strides = array<i32>} : memref<4x256xf32, #tpu.memory_space<vmem>>, vector<4x256xf32>,
    return
  }
  func.func @transform_0(%arg0: i32, %arg1: memref<1xi32, #tpu.memory_space<smem>>) -> (i32, i32) {
    %c0_i32 = arith.constant 0 : i32
    %c0_i32_0 = arith.constant 0 : i32
    return %c0_i32, %arg0 : i32, i32
  }
  func.func @transform_1(%arg0: i32, %arg1: memref<1xi32, #tpu.memory_space<smem>>) -> (i32, i32) {
    %c0_i32 = arith.constant 0 : i32
    %c0_i32_0 = arith.constant 0 : i32
    return %c0_i32, %arg0 : i32, i32
  }
}

</mosaic_0001>

<bundles_post_ra>
// kernel: tpu_custom_call.1
= control target key start
LH: loop header
LB: loop body
LE: loop exit
PB: predicated region body
PF: predicated region fallthrough
CT: control target
= control target key end

     0   :  { %8 = vsyncpa [#allocation5], 0  ;;  %s143_s0 = inlined_call_operand.<no memory space> [shape: s32[1], index: 0, kind: input, shape index: {}]   ;;  %s144_s1 = inlined_call_operand.hbm [shape: f32[4,256], index: 1, kind: input, shape index: {}]   ;;  %s145_s2 = inlined_call_operand.hbm [shape: f32[4,256], index: 2, kind: output, shape index: {}]  }
   0x1   :  { %9 = vsyncpa [#allocation6], 0  ;;  %s15_s11 = sshll.u32 %s144_s1, 4  ;;  %s117_s12 = smov [#allocation4]   ;;  %s16_s11 = int_to_ptr.hbm [resolvable:$true] %s15_s11 }
   0x2   :  { %s17_s13 = sshll.u32 %s117_s12, 4  ;;  %s18_s13 = int_to_ptr.vmem [resolvable:$true] %s17_s13 }
   0x3   :  { %20 = dma.hbm_to_vmem [thread:$0]  %s16_s11, 128, %s18_s13, [#allocation5]  }
   0x4   :  { %113 = dma.done.wait [#allocation5], 128  }
   0x5   :  { %114 = vsyncadd [#allocation5], 4294967168  ;;  %v27_v0 = vlaneseq  ;;  %v26_v1 = vld [vmem:[#allocation4] sm:$0xff]  ;;  %v29_v3 = vstv %s143_s0  ;;  %s118_s16 = smov [#allocation7]   ;;  %s53_s19 = sshll.u32 %s145_s2, 4  ;;  %vm42_vm1 = vcmask 1043456   ;;  %s54_s19 = int_to_ptr.hbm [resolvable:$true] %s53_s19 }
   0x6   :  { %32 = vst [vmem:[#allocation1] ss:$2 sm:$0xff] %v26_v1  ;;  %s51_s17 = sshll.u32 %s118_s16, 4  ;;  %s52_s17 = int_to_ptr.vmem [resolvable:$true] %s51_s17 }
   0x7   :  { %v28_v2 = vshrl.u32 %v27_v0, 7 }
   0x9   :  { %vm30_vm0 = vcmp.eq.s32.totalorder %v28_v2, %v29_v3 }
   0xd   :  { %v33_v4 = vld.sshfl [vmem:[#allocation1] sm:$0xff pattern:$0x75316420]  ;;  %v34_v5 = vld.sshfl [vmem:[#allocation1 + $0x8] sm:$0xff pattern:$0x75316420] }
   0xe   :  { %v38_v6 = vsel %vm30_vm0, 0.0, %v34_v5  ;;  %v37_v8 = vsel %vm30_vm0, 0.0, %v33_v4 }
   0xf   :  { %v41_v7 = vrot.slane %v38_v6, 4 }
  0x11   :  { %v43_v9 = vsel %vm42_vm1, %v37_v8, %v41_v7 }
  0x12   :  { %45 = vst [vmem:[#allocation7] sm:$0xff] %v43_v9 }
  0x13   :  { %56 = dma.vmem_to_hbm [thread:$0]  %s52_s17, 128, %s54_s19, [#allocation6]  }
  0x14   :  { %115 = dma.done.wait [#allocation6], 128  }
  0x15   :  { %116 = vsyncadd [#allocation6], 4294967168 }
  0x16   :  { %61 = vsyncpa [#allocation5], 1 }
  0x17   :  { %62 = vsyncpa [#allocation6], 1 }

</bundles_post_ra>
